<compile_context>
chip_gen: v7x
topology: tpu7x:2x2x1
jax: 0.10.0
libtpu: 0.0.40
codegen_flags: <defaults>
</compile_context>

<pallas_src>
import jax
import jax.numpy as jnp
from jax.experimental import pallas as pl
from jax.experimental.pallas import tpu as pltpu


_CompilerParams = getattr(pltpu, "CompilerParams", None) or getattr(
    pltpu, "TPUCompilerParams")


def _cdiv(a: int, b: int) -> int:
    return -(-a // b)


def _round_up(x: int, m: int) -> int:
    return _cdiv(x, m) * m


def _vmem_capacity_bytes() -> int:
    """Physical VMEM of the local chip; conservative (v7x) fallback."""
    try:
        info = pltpu.get_tpu_info()
        for attr in ("vmem_capacity_bytes", "vmem_bytes", "vmem_size_bytes"):
            val = getattr(info, attr, None)
            if val:
                return int(val)
    except Exception:
        pass
    return 64 << 20


def _plan_axis(dim: int, cap: int, align: int):
    """Return (tile, padded_dim).

    If the whole axis fits one tile, use the full (unpadded) extent — a block
    dim equal to the array dim is always layout-legal.  Otherwise pick the
    `align`-multiple tile <= cap that minimizes total padded size (primary)
    and step count (secondary).
    """
    if dim <= cap:
        return dim, dim
    padded0 = _round_up(dim, align)
    best = None
    for tile in range(align, cap + 1, align):
        steps = _cdiv(padded0, tile)
        key = (steps * tile, steps)
        if best is None or key < best[0]:
            best = (key, tile, steps * tile)
    return best[1], best[2]


def _make_kernel(has_bias: bool, multi_k: bool, use_scratch: bool, folded: bool):
    """Kernel factory.  Ref order: x, w, [bias], out, [f32 acc scratch]."""

    def kernel(*refs):
        i = 0
        x_ref = refs[i]; i += 1
        w_ref = refs[i]; i += 1
        b_ref = None
        if has_bias:
            b_ref = refs[i]; i += 1
        o_ref = refs[i]; i += 1
        acc_ref = refs[i] if use_scratch else o_ref

        def partial_product():
            if folded:
                # (tm, tb, tk) x (tm, tk, tn) -> (tm, tb, tn), batched over members.
                return jax.lax.dot_general(
                    x_ref[...], w_ref[...],
                    dimension_numbers=(((2,), (1,)), ((0,), (0,))),
                    preferred_element_type=jnp.float32)
            # Member axis squeezed: plain 2-D MXU matmul.
            return jnp.dot(x_ref[...], w_ref[...],
                           preferred_element_type=jnp.float32)

        if not multi_k:
            out = partial_product()
            if has_bias:
                out = out + b_ref[...].astype(jnp.float32)
            o_ref[...] = out.astype(o_ref.dtype)
            return

        k = pl.program_id(3)

        @pl.when(k == 0)
        def _init():
            if has_bias:
                acc_ref[...] = jnp.broadcast_to(
                    b_ref[...].astype(jnp.float32), acc_ref.shape
                ).astype(acc_ref.dtype)
            else:
                acc_ref[...] = jnp.zeros_like(acc_ref)

        acc_ref[...] += partial_product().astype(acc_ref.dtype)

        if use_scratch:
            @pl.when(k == pl.num_programs(3) - 1)
            def _finish():
                o_ref[...] = acc_ref[...].astype(o_ref.dtype)

    return kernel


def ensemble_linear(x, weight, bias=None, *, use_bf16_inputs=False):
    """Forward of EnsembleLinearLayer: out = x @ weight (+ bias).

    x: (M, B, IN), weight: (M, IN, OUT), bias: (M, 1, OUT) or None.
    """
    M, B, IN = x.shape
    Mw, INw, OUT = weight.shape
    assert (Mw, INw) == (M, IN), "weight must be (num_members, in_size, out_size)"
    if bias is not None:
        assert bias.shape == (M, 1, OUT), "bias must be (num_members, 1, out_size)"

    out_dtype = x.dtype
    in_bytes = 2 if use_bf16_inputs else jnp.dtype(x.dtype).itemsize
    out_bytes = jnp.dtype(out_dtype).itemsize

    # ---- generation-aware tile caps --------------------------------------
    vmem_cap = _vmem_capacity_bytes()
    big_vmem = vmem_cap >= (96 << 20)        # v5e/v6e: 128 MiB; v7x: 64 MiB
    lane_align = 128 if big_vmem else 256     # v7x MXU is 2x256^2
    sub_align = 16 if use_bf16_inputs else 8  # bf16 packs 2 rows per sublane

    if big_vmem:
        tb_cap, tk_cap, tn_cap = 512, 1024, 512
        vmem_ceiling = 96 << 20
        fold_budget = 16 << 20
    else:
        tb_cap = 512 if use_bf16_inputs else 256
        tk_cap, tn_cap = 1024, 512
        vmem_ceiling = 44 << 20
        fold_budget = 10 << 20

    # ---- padding-minimal, divisor-aware tile plan -------------------------
    tb, Bp = _plan_axis(B, tb_cap, sub_align)
    tk, INp = _plan_axis(IN, tk_cap, lane_align)
    tn, OUTp = _plan_axis(OUT, tn_cap, lane_align)
    nb, nn, nk = Bp // tb, OUTp // tn, INp // tk

    # ---- fold several members per grid step in the tiny regime ------------
    if nb == 1 and nn == 1 and nk == 1 and M > 1:
        per_member = 2 * ((B * IN + IN * OUT) * in_bytes + B * OUT * out_bytes)
        if bias is not None:
            per_member += 2 * OUT * jnp.dtype(bias.dtype).itemsize
        tm = max(1, min(M, fold_budget // max(1, per_member)))
        while M % tm:
            tm -= 1
    else:
        tm = 1
    squeeze_m = tm == 1

    multi_k = nk > 1
    use_scratch = multi_k and jnp.dtype(out_dtype) != jnp.dtype(jnp.float32)

    # ---- pad only when the plan actually requires it -----------------------
    # TODO(synk): for repeated forwards, pre-pad/pre-cast the weight once
    # outside the hot path instead of per call.
    xp = x
    if Bp != B or INp != IN:
        xp = jnp.pad(xp, ((0, 0), (0, Bp - B), (0, INp - IN)))
    wp = weight
    if INp != IN or OUTp != OUT:
        wp = jnp.pad(wp, ((0, 0), (0, INp - IN), (0, OUTp - OUT)))
    if use_bf16_inputs:
        xp = xp.astype(jnp.bfloat16)
        wp = wp.astype(jnp.bfloat16)
    bp = bias
    if bias is not None and OUTp != OUT:
        bp = jnp.pad(bias, ((0, 0), (0, 0), (0, OUTp - OUT)))

    # ---- specs --------------------------------------------------------------
    def mdims(shape3):
        # Squeeze the member block dim when tm == 1 so the kernel sees 2-D refs.
        return ((None,) + tuple(shape3[1:])) if squeeze_m else tuple(shape3)

    x_spec = pl.BlockSpec(mdims((tm, tb, tk)), lambda m, i, j, k: (m, i, k))
    w_spec = pl.BlockSpec(mdims((tm, tk, tn)), lambda m, i, j, k: (m, k, j))
    o_spec = pl.BlockSpec(mdims((tm, tb, tn)), lambda m, i, j, k: (m, i, j))
    in_specs = [x_spec, w_spec]
    operands = [xp, wp]
    if bias is not None:
        in_specs.append(
            pl.BlockSpec(mdims((tm, 1, tn)), lambda m, i, j, k: (m, 0, j)))
        operands.append(bp)

    scratch_shapes = []
    if use_scratch:
        acc_shape = (tb, tn) if squeeze_m else (tm, tb, tn)
        scratch_shapes = [pltpu.VMEM(acc_shape, jnp.float32)]

    grid = (M // tm, nb, nn, nk)

    # ---- explicit VMEM budget (double-buffered tiles + resident acc) ------
    b_bytes = jnp.dtype(bias.dtype).itemsize if bias is not None else 0
    need = 2 * (tm * tb * tk * in_bytes + tm * tk * tn * in_bytes
                + tm * tb * tn * out_bytes + tm * tn * b_bytes)
    if use_scratch:
        need += tm * tb * tn * 4
    vmem_limit = int(min(max(need + (4 << 20), 32 << 20), vmem_ceiling))

    kernel = _make_kernel(has_bias=bias is not None, multi_k=multi_k,
                          use_scratch=use_scratch, folded=not squeeze_m)

    out_p = pl.pallas_call(
        kernel,
        out_shape=jax.ShapeDtypeStruct((M, Bp, OUTp), out_dtype),
        grid_spec=pltpu.PrefetchScalarGridSpec(
            num_scalar_prefetch=0,
            grid=grid,
            in_specs=in_specs,
            out_specs=o_spec,
            scratch_shapes=scratch_shapes,
        ),
        compiler_params=_CompilerParams(
            dimension_semantics=("parallel", "parallel", "parallel", "arbitrary"),
            vmem_limit_bytes=vmem_limit,
        ),
    )(*operands)

    if Bp != B or OUTp != OUT:
        out_p = out_p[:, :B, :OUT]
    return out_p


if __name__ == "__main__":
    # Small shapes consistent with the module's forward semantics.
    num_members, batch, in_size, out_size = 4, 8, 32, 32

    key = jax.random.PRNGKey(0)
    k_x, k_w, k_b = jax.random.split(key, 3)

    # Deterministic "parameters" (torch.rand -> uniform [0, 1)).
    weight = jax.random.uniform(k_w, (num_members, in_size, out_size), dtype=jnp.float32)
    bias = jax.random.uniform(k_b, (num_members, 1, out_size), dtype=jnp.float32)
    x = jax.random.uniform(k_x, (num_members, batch, in_size), dtype=jnp.float32)

    out = jax.block_until_ready(ensemble_linear(x, weight, bias))
    ref = jnp.einsum("mbi,mio->mbo", x, weight,
                     precision=jax.lax.Precision.HIGHEST) + bias
    assert out.shape == (num_members, batch, out_size)
    assert jnp.allclose(out, ref, atol=1e-5, rtol=1e-5)

    # No-bias path.
    out_nb = jax.block_until_ready(ensemble_linear(x, weight, None))
    ref_nb = jnp.einsum("mbi,mio->mbo", x, weight,
                        precision=jax.lax.Precision.HIGHEST)
    assert jnp.allclose(out_nb, ref_nb, atol=1e-5, rtol=1e-5)

    # Non-power-of-two shape: single-tile K/N with NO wrapper padding/slicing.
    M2, B2, IN2, OUT2 = 2, 24, 640, 160
    k1, k2, k3 = jax.random.split(jax.random.PRNGKey(1), 3)
    x2 = jax.random.uniform(k1, (M2, B2, IN2), dtype=jnp.float32)
    w2 = jax.random.uniform(k2, (M2, IN2, OUT2), dtype=jnp.float32)
    b2 = jax.random.uniform(k3, (M2, 1, OUT2), dtype=jnp.float32)
    out2 = jax.block_until_ready(ensemble_linear(x2, w2, b2))
    ref2 = jnp.einsum("mbi,mio->mbo", x2, w2,
                      precision=jax.lax.Precision.HIGHEST) + b2
    assert out2.shape == (M2, B2, OUT2)
    assert jnp.allclose(out2, ref2, atol=1e-3, rtol=1e-4)

    # Large-K shape: exercises the K-tiled reduction accumulating directly into
    # the resident f32 output block (squeezed member axis, no scratch).
    M3, B3, IN3, OUT3 = 2, 16, 2560, 256
    k4, k5, k6 = jax.random.split(jax.random.PRNGKey(2), 3)
    x3 = jax.random.uniform(k4, (M3, B3, IN3), dtype=jnp.float32)
    w3 = jax.random.uniform(k5, (M3, IN3, OUT3), dtype=jnp.float32)
    b3 = jax.random.uniform(k6, (M3, 1, OUT3), dtype=jnp.float32)
    out3 = jax.block_until_ready(ensemble_linear(x3, w3, b3))
    ref3 = jnp.einsum("mbi,mio->mbo", x3, w3,
                      precision=jax.lax.Precision.HIGHEST) + b3
    assert out3.shape == (M3, B3, OUT3)
    assert jnp.allclose(out3, ref3, atol=5e-2, rtol=1e-4)

    # Optional bf16-input fast path (f32 accumulation), loose tolerance.
    out2_bf16 = jax.block_until_ready(
        ensemble_linear(x2, w2, b2, use_bf16_inputs=True))
    assert out2_bf16.shape == (M2, B2, OUT2)
    assert jnp.allclose(out2_bf16, ref2, atol=1.0, rtol=2e-2)

    print("KERNEL_OK")
</pallas_src>

<mosaic_0001>
module attributes {stable_mosaic.version = 11 : i64} {
  func.func @kernel(%arg0: i32, %arg1: i32, %arg2: i32, %arg3: i32, %arg4: memref<4x8x32xf32, #tpu.memory_space<vmem>>, %arg5: memref<4x32x32xf32, #tpu.memory_space<vmem>>, %arg6: memref<4x1x32xf32, #tpu.memory_space<vmem>>, %arg7: memref<4x8x32xf32, #tpu.memory_space<vmem>>) attributes {dimension_semantics = [#tpu.dimension_semantics<parallel>, #tpu.dimension_semantics<parallel>, #tpu.dimension_semantics<parallel>, #tpu.dimension_semantics<arbitrary>], iteration_bounds = array<i64: 1, 1, 1, 1>, scalar_prefetch = 0 : i64, scratch_operands = 0 : i64, tpu.core_type = #tpu.core_type<tc>, window_params = [{transform_indices = @transform_0, window_bounds = array<i64: 4, 8, 32>}, {transform_indices = @transform_1, window_bounds = array<i64: 4, 32, 32>}, {transform_indices = @transform_2, window_bounds = array<i64: 4, 1, 32>}, {transform_indices = @transform_3, window_bounds = array<i64: 4, 8, 32>}]} {
    %c0 = arith.constant 0 : index
    %c0_0 = arith.constant 0 : index
    %c0_1 = arith.constant 0 : index
    %0 = vector.load %arg4[%c0, %c0_0, %c0_1] : memref<4x8x32xf32, #tpu.memory_space<vmem>>, vector<4x8x32xf32>
    %c0_2 = arith.constant 0 : index
    %c0_3 = arith.constant 0 : index
    %c0_4 = arith.constant 0 : index
    %1 = vector.load %arg5[%c0_2, %c0_3, %c0_4] : memref<4x32x32xf32, #tpu.memory_space<vmem>>, vector<4x32x32xf32>
    %cst = arith.constant dense<0.000000e+00> : vector<4x8x32xf32>
    %2 = tpu.matmul %0, %1, %cst {dimension_numbers = #tpu.dot_dimension_numbers<[2], [1], [1], [2], [0, 0, 0, 1, 1, 2], [0], [0]>} : vector<4x8x32xf32>, vector<4x32x32xf32>, vector<4x8x32xf32> -> vector<4x8x32xf32>
    %c0_5 = arith.constant 0 : index
    %c0_6 = arith.constant 0 : index
    %c0_7 = arith.constant 0 : index
    %3 = vector.load %arg6[%c0_5, %c0_6, %c0_7] : memref<4x1x32xf32, #tpu.memory_space<vmem>>, vector<4x1x32xf32>
    %4 = vector.broadcast %3 : vector<4x1x32xf32> to vector<4x8x32xf32>
    %5 = arith.addf %2, %4 : vector<4x8x32xf32>
    %c0_8 = arith.constant 0 : index
    %c0_9 = arith.constant 0 : index
    %c0_10 = arith.constant 0 : index
    %6 = vector.load %arg7[%c0_8, %c0_9, %c0_10] : memref<4x8x32xf32, #tpu.memory_space<vmem>>, vector<4x8x32xf32>
    tpu.vector_store %arg7[%c0_8, %c0_9, %c0_10], %5 {strides = array<i32>} : memref<4x8x32xf32, #tpu.memory_space<vmem>>, vector<4x8x32xf32>,
    return
  }
  func.func @transform_0(%arg0: i32, %arg1: i32, %arg2: i32, %arg3: i32) -> (i32, i32, i32) {
    %c0_i32 = arith.constant 0 : i32
    return %arg0, %arg1, %arg3 : i32, i32, i32
  }
  func.func @transform_1(%arg0: i32, %arg1: i32, %arg2: i32, %arg3: i32) -> (i32, i32, i32) {
    %c0_i32 = arith.constant 0 : i32
    return %arg0, %arg3, %arg2 : i32, i32, i32
  }
  func.func @transform_2(%arg0: i32, %arg1: i32, %arg2: i32, %arg3: i32) -> (i32, i32, i32) {
    %c0_i32 = arith.constant 0 : i32
    %c0_i32_0 = arith.constant 0 : i32
    return %arg0, %c0_i32, %arg2 : i32, i32, i32
  }
  func.func @transform_3(%arg0: i32, %arg1: i32, %arg2: i32, %arg3: i32) -> (i32, i32, i32) {
    %c0_i32 = arith.constant 0 : i32
    return %arg0, %arg1, %arg2 : i32, i32, i32
  }
}

</mosaic_0001>

<bundles_post_ra>
// kernel: tpu_custom_call.1
= control target key start
LH: loop header
LB: loop body
LE: loop exit
PB: predicated region body
PF: predicated region fallthrough
CT: control target
= control target key end

     0   :  { %8 = vsyncpa [#allocation3], 0  ;;  %s679_s0 = inlined_call_operand.hbm [shape: f32[4,8,32], index: 0, kind: input, shape index: {}]   ;;  %s680_s1 = inlined_call_operand.hbm [shape: f32[4,32,32], index: 1, kind: input, shape index: {}]   ;;  %s681_s2 = inlined_call_operand.vmem [shape: f32[4,1,32], index: 2, kind: input, shape index: {}]   ;;  %s682_s3 = inlined_call_operand.hbm [shape: f32[4,8,32], index: 3, kind: output, shape index: {}]  }
   0x1   :  { %9 = vsyncpa [#allocation6], 0 }
   0x2   :  { %10 = vsyncpa [#allocation4], 0  ;;  %s582_s12 = smov [#allocation2]   ;;  %s510_s16 = scalar_lea.hbm %s679_s0, 512 }
   0x3   :  { %s16_s13 = sshll.u32 %s582_s12, 4  ;;  %p511_p0 = scmp.ne.s32.totalorder %s679_s0, %s510_s16  ;;  %s17_s13 = int_to_ptr.vmem [resolvable:$true] %s16_s13 }
   0x4   :  { %p514_p1 = scmp.lt.u32.totalorder %s510_s16, %s679_s0 }
   0x6   :  { %p516_p2 = pnand %p514_p1, %p511_p0 }
   0x8   :  { %519 = shalt.err (!%p516_p2)
}
   0x9   :  { %s520_s21 = scalar_lea.vmem %s17_s13, 512  ;;  %p525_p4 = scmp.lt.s32.totalorder %s17_s13, %s17_s13 }
   0xa   :  { %p521_p3 = scmp.ne.s32.totalorder %s17_s13, %s520_s21  ;;  %p526_p5 = scmp.lt.s32.totalorder %s520_s21, %s520_s21 }
   0xc   :  { %p527_p6 = por %p526_p5, %p525_p4 }
   0xe   :  { %p528_p7 = pnand %p527_p6, %p521_p3 }
  0x10   :  { %531 = shalt.err (!%p528_p7)
}
  0x11   :  { %s583_s22 = smov 128   ;;  %s584_s23 = smov 8  }
  0x12   :  { %22 = dma.hbm_to_vmem [thread:$0]  %s679_s0, 512, %s17_s13, [#allocation3], %s583_s22, %s583_s22, %s584_s23  }
  0x13   :  { %s585_s26 = smov [#allocation5]   ;;  %s532_s30 = scalar_lea.hbm %s680_s1, 2048 }
  0x14   :  { %s28_s27 = sshll.u32 %s585_s26, 4  ;;  %p533_p8 = scmp.ne.s32.totalorder %s680_s1, %s532_s30  ;;  %s29_s27 = int_to_ptr.vmem [resolvable:$true] %s28_s27 }
  0x15   :  { %p536_p9 = scmp.lt.u32.totalorder %s532_s30, %s680_s1 }
  0x17   :  { %p538_p10 = pnand %p536_p9, %p533_p8 }
  0x19   :  { %541 = shalt.err (!%p538_p10)
}
  0x1a   :  { %s542_s8 = scalar_lea.vmem %s29_s27, 2048  ;;  %p547_p12 = scmp.lt.s32.totalorder %s29_s27, %s29_s27 }
  0x1b   :  { %p543_p11 = scmp.ne.s32.totalorder %s29_s27, %s542_s8  ;;  %p548_p13 = scmp.lt.s32.totalorder %s542_s8, %s542_s8 }
  0x1d   :  { %p549_p0 = por %p548_p13, %p547_p12 }
  0x1f   :  { %p550_p1 = pnand %p549_p0, %p543_p11 }
  0x21   :  { %553 = shalt.err (!%p550_p1)
}
  0x22   :  { %34 = dma.hbm_to_vmem [thread:$0]  %s680_s1, 2048, %s29_s27, [#allocation6], %s583_s22, %s583_s22, %s584_s23  }
  0x23   :  { %576 = dma.done.wait [#allocation3], 512  }
  0x24   :  { %577 = vsyncadd [#allocation3], 4294966784 }
  0x25   :  { %578 = dma.done.wait [#allocation6], 2048  }
  0x26   :  { %579 = vsyncadd [#allocation6], 4294965248  ;;  %v586_v0 = vmov 0.0|0.0   ;;  %vm587_vm0 = vmmov 0   ;;  %v588_v1 = vmov 0.0   ;;  %v47_v2 = vld [vmem:[#allocation5] sm:$0xff] }
  0x27   :  { %478 = vmatprep.subr.bf16.mxu0 %v586_v0  ;;  %484 = vmatprep.subr.bf16.mxu1 %v586_v0  ;;  %v48_v3 = vld [vmem:[#allocation5 + $0x8] sm:$0xff]  ;;  %v51_v4 = vld [vmem:[#allocation5 + $0x20] sm:$0xff]  ;;  %v49_v7 = vld [vmem:[#allocation5 + $0x10] sm:$0xff]  ;;  %vm91_vm1 = vcmask 261120   ;;  %s589_s17 = smov [#allocation7]  }
  0x28   :  { %442 = vmatprep.mubr.msk.f32.mxu0 %vm587_vm0, %v588_v1  ;;  %453 = vmatprep.mubr.msk.f32.mxu1 %vm587_vm0, %v588_v1  ;;  %v479_v5 = vpack.c.bf16 %v48_v3, %v47_v2  ;;  %v52_v6 = vld [vmem:[#allocation5 + $0x28] sm:$0xff]  ;;  %v50_v8 = vld [vmem:[#allocation5 + $0x18] sm:$0xff]  ;;  %v53_v10 = vld [vmem:[#allocation5 + $0x30] sm:$0xff]  ;;  %s393_s18 = sshll.u32 %s589_s17, 4  ;;  %s394_s18 = int_to_ptr.vmem [resolvable:$true] %s393_s18 }
  0x29   :  { %v485_v9 = vpack.c.bf16 %v52_v6, %v51_v4  ;;  %v54_v11 = vld [vmem:[#allocation5 + $0x38] sm:$0xff]  ;;  %v482_v12 = vpack.c.bf16 %v50_v8, %v49_v7  ;;  %v55_v14 = vld [vmem:[#allocation5 + $0x40] sm:$0xff]  ;;  %v56_v15 = vld [vmem:[#allocation5 + $0x48] sm:$0xff]  ;;  %s554_s19 = scalar_lea.vmem %s394_s18, 512  ;;  %p559_p3 = scmp.lt.s32.totalorder %s394_s18, %s394_s18 }
  0x2a   :  { %480 = vmatpush3.bf16.msra.mxu0 %v479_v5  ;;  %v488_v13 = vpack.c.bf16 %v54_v11, %v53_v10  ;;  %v59_v16 = vld [vmem:[#allocation5 + $0x60] sm:$0xff]  ;;  %v60_v17 = vld [vmem:[#allocation5 + $0x68] sm:$0xff]  ;;  %v491_v19 = vpack.c.bf16 %v56_v15, %v55_v14  ;;  %v57_v22 = vld [vmem:[#allocation5 + $0x50] sm:$0xff]  ;;  %p555_p2 = scmp.ne.s32.totalorder %s394_s18, %s554_s19  ;;  %p560_p4 = scmp.lt.s32.totalorder %s554_s19, %s554_s19 }
  0x2b   :  { %486 = vmatpush3.bf16.msra.mxu1 %v485_v9  ;;  %481 = vmatprep.subr.bf16.mxu0 %v586_v0  ;;  %v43_v18 = vld [vmem:[#allocation2] sm:$0xff]  ;;  %v44_v20 = vld [vmem:[#allocation2 + $0x8] sm:$0xff]  ;;  %v497_v21 = vpack.c.bf16 %v60_v17, %v59_v16  ;;  %v58_v23 = vld [vmem:[#allocation5 + $0x58] sm:$0xff] }
  0x2c   :  { %487 = vmatprep.subr.bf16.mxu1 %v586_v0  ;;  %v61_v24 = vld [vmem:[#allocation5 + $0x70] sm:$0xff]  ;;  %v62_v25 = vld [vmem:[#allocation5 + $0x78] sm:$0xff]  ;;  %v494_v26 = vpack.c.bf16 %v58_v23, %v57_v22  ;;  %v406_v30 = vld [vmem:[%s681_s2] ss:$0 sm:$0xff]  ;;  %p561_p5 = por %p560_p4, %p559_p3 }
  0x2d   :  { %v500_v27 = vpack.c.bf16 %v62_v25, %v61_v24  ;;  %v45_v28 = vld [vmem:[#allocation2 + $0x10] sm:$0xff]  ;;  %v46_v29 = vld [vmem:[#allocation2 + $0x18] sm:$0xff]  ;;  %v407_v31 = vld [vmem:[%s681_s2 + $0x1] ss:$0 sm:$0xff] }
  0x2e   :  { %483 = vmatpush3.bf16.msra.mxu0 %v482_v12  ;;  %v408_v38 = vld [vmem:[%s681_s2 + $0x2] ss:$0 sm:$0xff]  ;;  %v409_v39 = vld [vmem:[%s681_s2 + $0x3] ss:$0 sm:$0xff]  ;;  %p562_p6 = pnand %p561_p5, %p555_p2 }
  0x2f   :  { %489 = vmatpush3.bf16.msra.mxu1 %v488_v13  ;;  %490 = vmatprep.subr.bf16.mxu0 %v586_v0 }
  0x30   :  { %496 = vmatprep.subr.bf16.mxu1 %v586_v0 }
  0x31   :  { %443 = vmatmul.mubr.msk.f32.vlgmr.msra.gmra.mrb[0].mxu0 %vm91_vm1, %v43_v18 }
  0x32   :  { %454 = vmatmul.mubr.msk.f32.vlgmr.msra.gmra.mrb[0].mxu1 %vm91_vm1, %v44_v20  ;;  %492 = vmatpush3.bf16.msra.mxu0 %v491_v19 }
  0x33   :  { %498 = vmatpush3.bf16.msra.mxu1 %v497_v21  ;;  %493 = vmatprep.subr.bf16.mxu0 %v586_v0 }
  0x34   :  { %499 = vmatprep.subr.bf16.mxu1 %v586_v0  ;;  %464 = vmatprep.mubr.msk.f32.mxu0 %vm587_vm0, %v588_v1 }
  0x35   :  { %475 = vmatprep.mubr.msk.f32.mxu1 %vm587_vm0, %v588_v1 }
  0x36   :  { %495 = vmatpush3.bf16.msra.mxu0 %v494_v26 }
  0x37   :  { %501 = vmatpush3.bf16.msra.mxu1 %v500_v27 }
  0x39   :  { %465 = vmatmul.mubr.msk.f32.vlgmr.msra.gmra.mrb[2].mxu0 %vm91_vm1, %v45_v28 }
  0x3a   :  { %476 = vmatmul.mubr.msk.f32.vlgmr.msra.gmra.mrb[2].mxu1 %vm91_vm1, %v46_v29 }
 0x104   :  { %v161_v32 = vpop.f32.mrb[0].mxu0 }
 0x105   :  { %v162_v33 = vadd.f32 %v406_v30, %v161_v32  ;;  %v234_v34 = vpop.f32.mrb[0].mxu1  ;;  %v444_v35 = vpop.f32.mrb[1].mxu0 }
 0x106   :  { %v235_v36 = vadd.f32 %v407_v31, %v234_v34  ;;  %v455_v37 = vpop.f32.mrb[1].mxu1 }
 0x107   :  { %384 = vst.msk [vmem:[#allocation7] sm:$0xff] %vm91_vm1, %v162_v33 }
 0x108   :  { %385 = vst.msk [vmem:[#allocation7 + $0x8] sm:$0xff] %vm91_vm1, %v235_v36 }
 0x10c   :  { %v307_v40 = vpop.f32.mrb[2].mxu0 }
 0x10d   :  { %v308_v41 = vadd.f32 %v408_v38, %v307_v40  ;;  %v380_v42 = vpop.f32.mrb[2].mxu1  ;;  %v466_v43 = vpop.f32.mrb[3].mxu0 }
 0x10e   :  { %v381_v44 = vadd.f32 %v409_v39, %v380_v42  ;;  %v477_v45 = vpop.f32.mrb[3].mxu1 }
 0x10f   :  { %386 = vst.msk [vmem:[#allocation7 + $0x10] sm:$0xff] %vm91_vm1, %v308_v41 }
 0x110   :  { %387 = vst.msk [vmem:[#allocation7 + $0x18] sm:$0xff] %vm91_vm1, %v381_v44 }
 0x111   :  { %565 = shalt.err (!%p562_p6)
}
 0x112   :  { %s566_s21 = scalar_lea.hbm %s682_s3, 512 }
 0x113   :  { %p567_p7 = scmp.ne.s32.totalorder %s682_s3, %s566_s21  ;;  %p570_p8 = scmp.lt.u32.totalorder %s566_s21, %s682_s3 }
 0x115   :  { %p572_p9 = pnand %p570_p8, %p567_p7 }
 0x117   :  { %575 = shalt.err (!%p572_p9)
}
 0x118   :  { %399 = dma.vmem_to_hbm [thread:$0]  %s394_s18, 512, %s682_s3, [#allocation4], %s583_s22, %s583_s22, %s584_s23  }
 0x119   :  { %580 = dma.done.wait [#allocation4], 512  }
 0x11a   :  { %581 = vsyncadd [#allocation4], 4294966784 }
 0x11b   :  { %403 = vsyncpa [#allocation3], 1 }
 0x11c   :  { %404 = vsyncpa [#allocation6], 1 }
 0x11d   :  { %405 = vsyncpa [#allocation4], 1 }

</bundles_post_ra>
